<compile_context>
chip_gen: v7x
topology: tpu7x:2x2x1
jax: 0.10.0
libtpu: 0.0.40
codegen_flags: <defaults>
</compile_context>

<pallas_src>
import functools

import jax
import jax.numpy as jnp
from jax.experimental import pallas as pl
from jax.experimental.pallas import tpu as pltpu


def _separable_conv1d_kernel(x_ref, dw_ref, pw_ref, bias_ref, out_ref, *, K, pad, L):
    # x_ref    : (C_in, Lw)    unpadded input row for this batch element
    # dw_ref   : (C_in, K)     depthwise filters (one FIR per channel)
    # pw_ref   : (C_out, C_in) pointwise 1x1 filters
    # bias_ref : (C_out, 1)
    # out_ref  : (C_out, Lw)   Lw == L_out (== L for odd K)
    x = x_ref[...]                                   # (C_in, Lw) f32
    dw = dw_ref[...]                                 # (C_in, K)
    Lw = x.shape[-1]
    lane = jax.lax.broadcasted_iota(jnp.int32, x.shape, 1)

    def tap(k):
        # Want x[:, l + k - pad], zero outside [0, L).  Shift on the XLU
        # (pltpu.roll) and mask wrapped / out-of-range lanes on the VPU.
        s = pad - k                                  # logical right shift
        if s % Lw == 0:
            xk = x
        else:
            xk = pltpu.roll(x, shift=s % Lw, axis=1)
        if s != 0 or L != Lw:
            src = lane - s                           # source index l + k - pad
            xk = jnp.where((src >= 0) & (src < L), xk, 0.0)
        return dw[:, k:k + 1] * xk                   # broadcast tap over lanes

    # Depthwise FIR: accumulator seeded by tap 0 (no extra zero-init pass).
    acc = tap(0)
    for k in range(1, K):
        acc = acc + tap(k)

    # Pointwise 1x1 conv == channel-mixing matmul on the MXU, fused bias add.
    y = jnp.dot(pw_ref[...], acc, preferred_element_type=jnp.float32)
    out_ref[...] = (y + bias_ref[...]).astype(out_ref.dtype)


def separable_conv1d(x, dw_weight, pw_weight, bias, kernel_size):
    """x: (B, C_in, L) f32 -> (B, C_out, L_out); PyTorch SeparableConv1D semantics."""
    B, C_in, L = x.shape
    C_out = pw_weight.shape[0]
    K = int(kernel_size)
    pad = K // 2
    L_out = L + 2 * pad - (K - 1)        # == L for odd K, L + 1 for even K
    Lw = L_out
    if Lw != L:
        # Even K: the output is one column longer than the input; append a
        # single zero column so all shifted windows share one width.  Odd K
        # (the normal "same"-padding case) takes this pad-free fast path.
        x = jnp.pad(x, ((0, 0), (0, 0), (0, Lw - L)))

    kernel = functools.partial(_separable_conv1d_kernel, K=K, pad=pad, L=L)

    # Scoped-VMEM budget: double-buffered blocks + in-kernel f32 temporaries,
    # with generous headroom; capped below v7x's 64 MiB physical VMEM.
    itemsize = jnp.dtype(x.dtype).itemsize
    per_step = itemsize * (C_in * Lw + C_in * K + C_out * C_in + C_out + C_out * Lw)
    live_f32 = 4 * (3 * C_in * Lw + 2 * C_out * Lw)
    vmem_limit = int(min(64 * 2**20, max(4 * (2 * per_step + live_f32), 16 * 2**20)))

    return pl.pallas_call(
        kernel,
        out_shape=jax.ShapeDtypeStruct((B, C_out, L_out), x.dtype),
        grid_spec=pltpu.PrefetchScalarGridSpec(
            num_scalar_prefetch=0,
            grid=(B,),
            in_specs=[
                pl.BlockSpec((pl.Squeezed(), C_in, Lw), lambda b: (b, 0, 0)),
                pl.BlockSpec((C_in, K), lambda b: (0, 0)),
                pl.BlockSpec((C_out, C_in), lambda b: (0, 0)),
                pl.BlockSpec((C_out, 1), lambda b: (0, 0)),
            ],
            out_specs=pl.BlockSpec((pl.Squeezed(), C_out, L_out), lambda b: (b, 0, 0)),
        ),
        compiler_params=pltpu.CompilerParams(
            dimension_semantics=("parallel",),   # batch shards across v7x's 2 TCs
            vmem_limit_bytes=vmem_limit,
        ),
    )(x, dw_weight, pw_weight, bias)


def _reference(x, dw_weight, pw_weight, bias, kernel_size):
    """Pure-JAX reference mirroring nn.Conv1d depthwise + pointwise + bias."""
    C_in = x.shape[1]
    pad = kernel_size // 2
    dw = jax.lax.conv_general_dilated(
        x, dw_weight[:, None, :],
        window_strides=(1,), padding=[(pad, pad)],
        dimension_numbers=("NCH", "OIH", "NCH"),
        feature_group_count=C_in)
    pw = jax.lax.conv_general_dilated(
        dw, pw_weight[:, :, None],
        window_strides=(1,), padding=[(0, 0)],
        dimension_numbers=("NCH", "OIH", "NCH"))
    return pw + bias[None]


if __name__ == "__main__":
    B, C_in, C_out, L, K = 2, 4, 8, 16, 3

    key = jax.random.PRNGKey(0)
    kx, kdw, kpw, kb = jax.random.split(key, 4)
    x = jax.random.normal(kx, (B, C_in, L), dtype=jnp.float32)
    # depthwise: nn.Conv1d(C_in, C_in, K, groups=C_in, bias=False) weight (C_in, 1, K) -> stored (C_in, K)
    dw_weight = jax.random.normal(kdw, (C_in, K), dtype=jnp.float32) * 0.1
    # pointwise: nn.Conv1d(C_in, C_out, 1, bias=False) weight (C_out, C_in, 1) -> stored (C_out, C_in)
    pw_weight = jax.random.normal(kpw, (C_out, C_in), dtype=jnp.float32) * 0.1
    # module initializes bias to zeros(C_out, 1); random here so the check is meaningful
    bias = jax.random.normal(kb, (C_out, 1), dtype=jnp.float32) * 0.1

    out = separable_conv1d(x, dw_weight, pw_weight, bias, K)
    out = jax.block_until_ready(out)

    ref = _reference(x, dw_weight, pw_weight, bias, K)
    assert out.shape == ref.shape == (B, C_out, L), (out.shape, ref.shape)
    assert jnp.allclose(out, ref, atol=1e-5, rtol=1e-5), "mismatch vs reference"
    print("KERNEL_OK")
</pallas_src>

<mosaic_0001>
module attributes {stable_mosaic.version = 11 : i64} {
  func.func @_separable_conv1d_kernel(%arg0: i32, %arg1: memref<1x4x16xf32, #tpu.memory_space<vmem>>, %arg2: memref<4x3xf32, #tpu.memory_space<vmem>>, %arg3: memref<8x4xf32, #tpu.memory_space<vmem>>, %arg4: memref<8x1xf32, #tpu.memory_space<vmem>>, %arg5: memref<1x8x16xf32, #tpu.memory_space<vmem>>) attributes {dimension_semantics = [#tpu.dimension_semantics<parallel>], iteration_bounds = array<i64: 2>, scalar_prefetch = 0 : i64, scratch_operands = 0 : i64, tpu.core_type = #tpu.core_type<tc>, window_params = [{transform_indices = @transform_0, window_bounds = array<i64: 1, 4, 16>}, {pipeline_mode = #tpu.pipeline_mode<synchronous>, transform_indices = @transform_1, window_bounds = array<i64: 4, 3>}, {pipeline_mode = #tpu.pipeline_mode<synchronous>, transform_indices = @transform_2, window_bounds = array<i64: 8, 4>}, {pipeline_mode = #tpu.pipeline_mode<synchronous>, transform_indices = @transform_3, window_bounds = array<i64: 8, 1>}, {transform_indices = @transform_4, window_bounds = array<i64: 1, 8, 16>}]} {
    %c0 = arith.constant 0 : index
    %c0_0 = arith.constant 0 : index
    %c0_1 = arith.constant 0 : index
    %0 = vector.load %arg1[%c0, %c0_0, %c0_1] : memref<1x4x16xf32, #tpu.memory_space<vmem>>, vector<1x4x16xf32>
    %1 = vector.shape_cast %0 : vector<1x4x16xf32> to vector<4x16xf32>
    %c0_2 = arith.constant 0 : index
    %c0_3 = arith.constant 0 : index
    %2 = vector.load %arg2[%c0_2, %c0_3] : memref<4x3xf32, #tpu.memory_space<vmem>>, vector<4x3xf32>
    %3 = tpu.iota {dimensions = array<i32: 1>} : vector<4x16xi32>
    %c1_i32 = arith.constant 1 : i32
    %4 = tpu.dynamic_rotate %1 by %c1_i32 dim 1 : vector<4x16xf32>, i32 -> vector<4x16xf32>
    %c1_i32_4 = arith.constant 1 : i32
    %5 = vector.broadcast %c1_i32_4 : i32 to vector<4x16xi32>
    %6 = arith.subi %3, %5 : vector<4x16xi32>
    %c0_i32 = arith.constant 0 : i32
    %7 = vector.broadcast %c0_i32 : i32 to vector<4x16xi32>
    %8 = arith.cmpi sge, %6, %7 : vector<4x16xi32>
    %c16_i32 = arith.constant 16 : i32
    %9 = vector.broadcast %c16_i32 : i32 to vector<4x16xi32>
    %10 = arith.cmpi slt, %6, %9 : vector<4x16xi32>
    %11 = arith.andi %8, %10 : vector<4x16xi1>
    %cst = arith.constant 0.000000e+00 : f32
    %12 = vector.broadcast %cst : f32 to vector<4x16xf32>
    %13 = arith.select %11, %4, %12 : vector<4x16xi1>, vector<4x16xf32>
    %14 = vector.extract_strided_slice %2 {offsets = [0, 0], sizes = [4, 1], strides = [1, 1]} : vector<4x3xf32> to vector<4x1xf32>
    %15 = vector.broadcast %14 : vector<4x1xf32> to vector<4x16xf32>
    %16 = arith.mulf %15, %13 : vector<4x16xf32>
    %17 = vector.extract_strided_slice %2 {offsets = [0, 1], sizes = [4, 1], strides = [1, 1]} : vector<4x3xf32> to vector<4x1xf32>
    %18 = vector.broadcast %17 : vector<4x1xf32> to vector<4x16xf32>
    %19 = arith.mulf %18, %1 : vector<4x16xf32>
    %20 = arith.addf %16, %19 : vector<4x16xf32>
    %c15_i32 = arith.constant 15 : i32
    %21 = tpu.dynamic_rotate %1 by %c15_i32 dim 1 : vector<4x16xf32>, i32 -> vector<4x16xf32>
    %c-1_i32 = arith.constant -1 : i32
    %22 = vector.broadcast %c-1_i32 : i32 to vector<4x16xi32>
    %23 = arith.subi %3, %22 : vector<4x16xi32>
    %c0_i32_5 = arith.constant 0 : i32
    %24 = vector.broadcast %c0_i32_5 : i32 to vector<4x16xi32>
    %25 = arith.cmpi sge, %23, %24 : vector<4x16xi32>
    %c16_i32_6 = arith.constant 16 : i32
    %26 = vector.broadcast %c16_i32_6 : i32 to vector<4x16xi32>
    %27 = arith.cmpi slt, %23, %26 : vector<4x16xi32>
    %28 = arith.andi %25, %27 : vector<4x16xi1>
    %cst_7 = arith.constant 0.000000e+00 : f32
    %29 = vector.broadcast %cst_7 : f32 to vector<4x16xf32>
    %30 = arith.select %28, %21, %29 : vector<4x16xi1>, vector<4x16xf32>
    %31 = vector.extract_strided_slice %2 {offsets = [0, 2], sizes = [4, 1], strides = [1, 1]} : vector<4x3xf32> to vector<4x1xf32>
    %32 = vector.broadcast %31 : vector<4x1xf32> to vector<4x16xf32>
    %33 = arith.mulf %32, %30 : vector<4x16xf32>
    %34 = arith.addf %20, %33 : vector<4x16xf32>
    %c0_8 = arith.constant 0 : index
    %c0_9 = arith.constant 0 : index
    %35 = vector.load %arg3[%c0_8, %c0_9] : memref<8x4xf32, #tpu.memory_space<vmem>>, vector<8x4xf32>
    %cst_10 = arith.constant dense<0.000000e+00> : vector<8x16xf32>
    %36 = tpu.matmul %35, %34, %cst_10 {dimension_numbers = #tpu.dot_dimension_numbers<[1], [0], [0], [1], [0, 0, 1, 1], [], []>} : vector<8x4xf32>, vector<4x16xf32>, vector<8x16xf32> -> vector<8x16xf32>
    %c0_11 = arith.constant 0 : index
    %c0_12 = arith.constant 0 : index
    %37 = vector.load %arg4[%c0_11, %c0_12] : memref<8x1xf32, #tpu.memory_space<vmem>>, vector<8x1xf32>
    %38 = vector.broadcast %37 : vector<8x1xf32> to vector<8x16xf32>
    %39 = arith.addf %36, %38 : vector<8x16xf32>
    %c0_13 = arith.constant 0 : index
    %c0_14 = arith.constant 0 : index
    %c0_15 = arith.constant 0 : index
    %40 = vector.load %arg5[%c0_13, %c0_14, %c0_15] : memref<1x8x16xf32, #tpu.memory_space<vmem>>, vector<1x8x16xf32>
    %41 = vector.shape_cast %40 : vector<1x8x16xf32> to vector<8x16xf32>
    %42 = vector.shape_cast %39 : vector<8x16xf32> to vector<1x8x16xf32>
    tpu.vector_store %arg5[%c0_13, %c0_14, %c0_15], %42 {strides = array<i32>} : memref<1x8x16xf32, #tpu.memory_space<vmem>>, vector<1x8x16xf32>,
    return
  }
  func.func @transform_0(%arg0: i32) -> (i32, i32, i32) {
    %c0_i32 = arith.constant 0 : i32
    %c0_i32_0 = arith.constant 0 : i32
    %c0_i32_1 = arith.constant 0 : i32
    return %arg0, %c0_i32, %c0_i32_0 : i32, i32, i32
  }
  func.func @transform_1(%arg0: i32) -> (i32, i32) {
    %c0_i32 = arith.constant 0 : i32
    %c0_i32_0 = arith.constant 0 : i32
    %c0_i32_1 = arith.constant 0 : i32
    return %c0_i32, %c0_i32_0 : i32, i32
  }
  func.func @transform_2(%arg0: i32) -> (i32, i32) {
    %c0_i32 = arith.constant 0 : i32
    %c0_i32_0 = arith.constant 0 : i32
    %c0_i32_1 = arith.constant 0 : i32
    return %c0_i32, %c0_i32_0 : i32, i32
  }
  func.func @transform_3(%arg0: i32) -> (i32, i32) {
    %c0_i32 = arith.constant 0 : i32
    %c0_i32_0 = arith.constant 0 : i32
    %c0_i32_1 = arith.constant 0 : i32
    return %c0_i32, %c0_i32_0 : i32, i32
  }
  func.func @transform_4(%arg0: i32) -> (i32, i32, i32) {
    %c0_i32 = arith.constant 0 : i32
    %c0_i32_0 = arith.constant 0 : i32
    %c0_i32_1 = arith.constant 0 : i32
    return %arg0, %c0_i32, %c0_i32_0 : i32, i32, i32
  }
}

</mosaic_0001>

<bundles_post_ra>
// kernel: tpu_custom_call.1
= control target key start
LH: loop header
LB: loop body
LE: loop exit
PB: predicated region body
PF: predicated region fallthrough
CT: control target
= control target key end

     0   :  { %9 = vsyncpa [#allocation3], 0  ;;  %s678_s0 = inlined_call_operand.vmem [shape: f32[2,4,16], index: 0, kind: input, shape index: {}]   ;;  %s679_s1 = inlined_call_operand.vmem [shape: f32[4,3], index: 1, kind: input, shape index: {}]   ;;  %s680_s2 = inlined_call_operand.vmem [shape: f32[8,4], index: 2, kind: input, shape index: {}]   ;;  %s681_s3 = inlined_call_operand.vmem [shape: f32[8,1], index: 3, kind: input, shape index: {}]   ;;  %s682_s4 = inlined_call_operand.hbm [shape: f32[2,8,16], index: 4, kind: output, shape index: {}]  }
   0x1   :  { %11 = vsyncpa [#allocation3 + $0x1], 0  ;;  %s569_s15 = smov 0   ;;  %s571_s16 = smov 0  }
   0x2   :  { %s573_s17 = smov 0   ;;  %s575_s18 = smov 0  }
   0x3 LB: > { %s590_s19 = sadd.s32 4294967295, %s533_s18   ;;  %s399_s20 = sadd.s32 4294967294, %s533_s18   ;;  %s533_s18 = sphi %s575_s18, %s688_s18   ;;  %s529_s17 = sphi %s573_s17, %s687_s17   ;;  %s525_s16 = sphi %s571_s16, %s686_s16   ;;  %s521_s15 = sphi %s569_s15, %s685_s15  }
   0x4   : > { %s594_s21 = sadd.s32 1, %s533_s18   ;;  %s113_s22 = sadd.s32 1, %s529_s17 }
   0x5   : > { %s110_s23 = ssub.s32 %s533_s18, %s594_s21  ;;  %p123_p0 = scmp.ne.s32.totalorder %s529_s17, %s525_s16 }
   0x6   : > { %p111_p1 = scmp.eq.s32.totalorder %s110_s23, 0  ;;  %p124_p2 = scmp.eq.s32.totalorder %s590_s19, 1 }
   0x7   : > { %p129_p3 = scmp.ne.s32.totalorder %s525_s16, %s521_s15  ;;  %p130_p4 = scmp.eq.s32.totalorder %s399_s20, 1 }
   0x8   : > { %s605_s24 = scalar_select %p111_p1, %s529_s17, %s113_s22  }
   0x9   : > { %p607_p5 = por %p124_p2, %p123_p0  ;;  %p611_p6 = por %p130_p4, %p129_p3 }
   0xa   : > { %p402_p7 = scmp.ge.s32.totalorder %s533_s18, 1  ;;  %p164_p8 = scmp.lt.s32.totalorder %s533_s18, 3 }
   0xc   : > { %p165_p9 = pnand %p402_p7, %p164_p8 }
   0xd   : > { %p189_p10 = scmp.lt.s32.totalorder (!%p165_p9), %s590_s19, 1  ;;  %v194_v0 = vld [vmem:[%s679_s1] sm:$0xf] (!%p165_p9)  ;;  %v535_v1 = vmov (!%p165_p9), 0   ;;  %v536_v2 = vmov (!%p165_p9), 2   ;;  %v537_v4 = vmov (!%p165_p9), 1   ;;  %v195_v11 = vlaneseq (!%p165_p9) }
   0xe   : > { %168 = sbr.rel (%p165_p9) target bundleno = 611 (0x263), region = 36  ;;  %467 = vset.pattern.permute.xlu1 (!%p165_p9), %v535_v1  ;;  %469 = vset.pattern.permute.xlu0 (!%p165_p9), %v536_v2  ;;  %s538_s8 = smov (!%p165_p9), 16   ;;  %vm197_vm0 = vcmask (!%p165_p9), 1047680   ;;  %v539_v7 = vmov (!%p165_p9), 0.0   ;;  %vm540_vm1 = vmmov (!%p165_p9), 0   ;;  %v240_v8 = vld [vmem:[%s681_s3] sm:$0xff] (!%p165_p9) }
   0xf   : > { %215 = vperm.xlu1 (!%p165_p9), %467, %v194_v0   ;;  %415 = vmatprep.subr.mxu0 (!%p165_p9), %v539_v7  ;;  %s541_s11 = smov (!%p165_p9), 113   ;;  %s542_s12 = smov (!%p165_p9), 127   ;;  %v196_v12 = vand.u32 (!%p165_p9), 127, %v195_v11  ;;  %vm250_vm6 = vcmask (!%p165_p9), 1043456   ;;  %v239_v27 = vld [vmem:[%s680_s2] sm:$0xff] (!%p165_p9)  ;;  %vm246_vm7 = vcmask (!%p165_p9), 31744  }
  0x10   : > { %417 = vmatprep.mubr.msk.f32.mxu0 (!%p165_p9), %vm540_vm1, %v539_v7  ;;  %s186_s20 = sand.u32 (!%p165_p9), 1, %s525_s16   ;;  %s410_s23 = sshll.u32 (!%p165_p9), %s590_s19, 7  ;;  %vm324_vm8 = vcmask (!%p165_p9), 130048  }
  0x11   : > { %v405_v14 = vadd.s32 (!%p165_p9), 4294967295, %v196_v12  ;;  %v406_v16 = vadd.s32 (!%p165_p9), 1, %v196_v12  ;;  %s403_s22 = sshll.u32 (!%p165_p9), %s186_s20, 3  ;;  %s636_s5 = scalar_lea.hbm (!%p165_p9), %s682_s4, %s410_s23 }
  0x12   : > { %s188_s27 = scalar_lea.vmem (!%p165_p9), [#allocation2], %s403_s22  ;;  %s327_s6 = scalar_lea.sflag (!%p165_p9), [#allocation3], %s186_s20 }
  0x13   : > { %468 = vset.pattern.permute.xlu1 (!%p165_p9), %v537_v4  ;;  %vm205_vm2 = vcmp.ge.s32.totalorder (!%p165_p9), %v405_v14, 0  ;;  %vm206_vm3 = vcmp.lt.s32.totalorder (!%p165_p9), %v405_v14, 16  ;;  %vm227_vm5 = vcmp.lt.s32.totalorder (!%p165_p9), %v406_v16, 16  ;;  %s340_s28 = sshll.u32 (!%p165_p9), %s188_s27, 4  ;;  %s638_s28 = int_to_ptr.vmem [resolvable:$true] %s340_s28 }
  0x14   : > { %220 = vperm.xlu1 (!%p165_p9), %468, %v194_v0   ;;  %vm207_vm4 = vmand (!%p165_p9), %vm205_vm2, %vm206_vm3 }
  0x15   : > { %s190_s29 = scalar_select %p189_p10, %s590_s19, 1 }
  0x16   : > { %s543_s19 = smov [#allocation2]  }
  0x17   : > { %s404_s30 = sshll.u32 %s190_s29, 2 }
  0x18   : > { %s192_s7 = scalar_lea.vmem %s678_s0, %s404_s30 }
  0x19   : > { %v193_v3 = vld [vmem:[%s192_s7] sm:$0xf]  ;;  %s471_s7 = scalar_lea.vmem %s638_s28, 128 }
  0x1a   : > { %198 = vrot.lane.b32.xlu0 %v193_v3, %s538_s8  ;;  %p472_p11 = scmp.ne.s32.totalorder %s638_s28, %s471_s7 }
  0x1c   : > { %p473_p12 = pnand %p472_p11, %p607_p5 }
  0x1e   : > { %p474_p13 = pneg %p473_p12 }
  0x8c   : > { %v199_v5 = vpop.permute.xlu0 %198 }
  0x8d   : > { %v200_v6 = vsel %vm197_vm0, %v199_v5, %v193_v3 }
  0x8e   : > { %201 = vrot.lane.b32.xlu0 %v200_v6, %s538_s8  ;;  %v216_v13 = vpop.permute.xlu1 %215  ;;  %s475_s8 = sshll.u32 %s543_s19, 4  ;;  %s476_s8 = int_to_ptr.vmem [resolvable:$false] %s475_s8 }
  0x8f   : > { %s477_s9 = scalar_lea.vmem %s476_s8, 256  ;;  %p478_p0 = scmp.lt.s32.totalorder %s638_s28, %s476_s8 }
  0x90   : > { %p479_p1 = scmp.lt.s32.totalorder %s477_s9, %s471_s7 }
  0x92   : > { %234 = vperm.xlu0 %469, %v194_v0   ;;  %p480_p2 = por %p479_p1, %p478_p0 }
  0x93   : > { %v221_v15 = vpop.permute.xlu1 %220 }
  0x94   : > { %v223_v21 = vmul.f32 %v221_v15, %v193_v3  ;;  %p481_p3 = pnand %p480_p2, %p474_p13 }
  0x96   : > { %470 = vset.pattern.permute.xlu0 %v535_v1 }
  0x97   : > { %243 = vperm.xlu0 %470, %v240_v8  }
 0x100   : > { %v202_v9 = vpop.permute.xlu0 %201 }
 0x101   : > { %v203_v10 = vsel %vm197_vm0, %v202_v9, %v193_v3 }
 0x102   : > { %209 = vrot.lane.b32.xlu1 %v203_v10, %s541_s11 }
 0x106   : > { %229 = vrot.lane.b32.xlu1 %v203_v10, %s542_s12 }
 0x111   : > { %v235_v20 = vpop.permute.xlu0 %234 }
 0x116   : > { %v244_v28 = vpop.permute.xlu0 %243 }
 0x174   : > { %v210_v17 = vpop.permute.xlu1 %209 }
 0x175   : > { %v212_v18 = vsel %vm207_vm4, %v210_v17, 0.0 }
 0x176   : > { %v218_v19 = vmul.f32 %v216_v13, %v212_v18 }
 0x178   : > { %v230_v22 = vpop.permute.xlu1 %229  ;;  %v224_v24 = vadd.f32 %v223_v21, %v218_v19 }
 0x179   : > { %v232_v23 = vsel %vm227_vm5, %v230_v22, 0.0 }
 0x17a   : > { %v237_v25 = vmul.f32 %v235_v20, %v232_v23 }
 0x17c   : > { %v238_v26 = vadd.f32 %v237_v25, %v224_v24 }
 0x17e   : > { %416 = vmatpush3.msk.msra.mxu0 %vm250_vm6, %v238_v26 }
 0x17f   : > { %418 = vmatmul.mubr.msk.f32.vlgmr.msra.gmra.mrb[0].mxu0 %vm246_vm7, %v239_v27 }
 0x252   : > { %v320_v29 = vpop.f32.mrb[0].mxu0 }
 0x253   : > { %v321_v30 = vadd.f32 %v320_v29, %v244_v28  ;;  %v419_v31 = vpop.f32.mrb[1].mxu0 }
 0x255   : > { %325 = vst.msk [vmem:[%s188_s27] sm:$0xff] %vm324_vm8, %v321_v30 }
 0x256   : > { %484 = shalt.err (!%p481_p3)
}
 0x257   : > { %s485_s10 = scalar_lea.hbm %s636_s5, 128  ;;  %s489_s13 = scalar_lea.hbm %s682_s4, 256 }
 0x258   : > { %p486_p4 = scmp.ne.s32.totalorder %s636_s5, %s485_s10  ;;  %p490_p9 = scmp.lt.u32.totalorder %s636_s5, %s682_s4 }
 0x259   : > { %p491_p10 = scmp.lt.u32.totalorder %s489_s13, %s485_s10  ;;  %p493_p12 = scmp.lt.u32.totalorder %s485_s10, %s636_s5 }
 0x25a   : > { %p487_p7 = pnand %p486_p4, %p607_p5 }
 0x25b   : > { %p492_p11 = por %p491_p10, %p490_p9 }
 0x25c   : > { %p488_p8 = pneg %p487_p7 }
 0x25d   : > { %p494_p13 = por %p493_p12, %p492_p11 }
 0x25f   : > { %p495_p0 = pnand %p494_p13, %p488_p8 }
 0x261   : > { %498 = shalt.err (!%p495_p0)
}
 0x262   : > { %420 = dma.vmem_to_hbm [thread:$0]  (%p607_p5), %s638_s28, 128, %s636_s5, %s327_s6  }
 0x263 PF: > { %p426_p1 = scmp.ge.s32.totalorder %s533_s18, 2  ;;  %s352_s22 = sand.u32 1, %s521_s15  }
 0x264   : > { %s353_s23 = scalar_lea.sflag [#allocation3], %s352_s22 }
 0x265   : > { %p423_p2 = pnand %p426_p1, %p611_p6 }
 0x267   : > { %516 = dma.done.wait (!%p423_p2), %s353_s23, 128  }
 0x268   : > { %518 = vsyncadd (!%p423_p2), %s353_s23, 4294967168  ;;  %p14_p3 = scmp.ge.s32.totalorder %s594_s21, 4   ;;  %s685_s15 = smov %s525_s16 }
 0x269   : > { %s686_s16 = smov %s529_s17  ;;  %s687_s17 = smov %s605_s24 }
 0x26a   : > { %s688_s18 = smov %s594_s21  ;;  %16 = sbr.rel (!%p14_p3) target bundleno = 3 (0x3), region = 71 }
 0x271   :  { %358 = vsyncpa [#allocation3], 1 }
 0x272   :  { %360 = vsyncpa [#allocation3 + $0x1], 1 }

</bundles_post_ra>
